<compile_context>
chip_gen: v6e
topology: v6e:2x2x1
jax: 0.10.0
libtpu: 0.0.40
codegen_flags: <defaults>
</compile_context>

<pallas_src>
import functools

import jax
import jax.numpy as jnp
from jax.experimental import pallas as pl
from jax.experimental.pallas import tpu as pltpu


def tcn_kernel(x_ref,                # (TB*L, Cin)  bf16 raw input tile
               w1_ref, t1_ref,       # (Cin, 3*C1) bf16 (BN1 scale folded), (1, C1) f32 shift
               w2_ref, t2_ref,       # (C1, 3*C2) bf16 (BN2 scale folded), (1, C2) f32 shift
               fc1w_ref, fc1b_ref,   # (C2, H) bf16 (1/L folded), (1, H) f32
               fc2w_ref, fc2b_ref,   # (H, O) bf16, (1, O) f32
               o_ref,                # (TB, O) f32
               *, L):
    f32 = jnp.float32
    bf16 = jnp.bfloat16
    n = x_ref.shape[0]               # TB * L
    tb = o_ref.shape[0]
    c1 = t1_ref.shape[-1]
    c2 = t2_ref.shape[-1]

    # ---- boundary masks computed in-kernel (VPU; no HBM/VMEM mask inputs) ----
    # pos = t mod L, computed exactly with float ops (L is a static Python int;
    # the +0.5 offset keeps floor() exact despite reciprocal rounding).
    t = jax.lax.broadcasted_iota(jnp.int32, (n, 1), 0).astype(f32)
    q = jnp.floor((t + 0.5) * (1.0 / L))
    pos = t - q * L
    not_first = (pos > 0.5).astype(f32)          # pos != 0     -> keep "prev" tap
    not_last = (pos < L - 1.5).astype(f32)       # pos != L-1   -> keep "next" tap

    # ---- Conv1d #1 (k=3, pad=1) + folded BN1 + ReLU: one fused N=3*C1 matmul ----
    y = jnp.dot(x_ref[...], w1_ref[...], preferred_element_type=f32)   # (n, 3*C1)
    # roll(+1): row t gets slice[t-1]; roll(n-1): row t gets slice[t+1].
    # Masks zero the t==0 / t==L-1 rows and any cross-sample wrap.
    y_prev = pltpu.roll(y[:, :c1], shift=1, axis=0) * not_first
    y_next = pltpu.roll(y[:, 2 * c1:], shift=n - 1, axis=0) * not_last
    h1 = jnp.maximum(y_prev + y[:, c1:2 * c1] + y_next + t1_ref[...], 0.0)

    # ---- Conv1d #2 (k=3, pad=1) + folded BN2 + ReLU: one fused N=3*C2 matmul ----
    z = jnp.dot(h1.astype(bf16), w2_ref[...], preferred_element_type=f32)  # (n, 3*C2)
    z_prev = pltpu.roll(z[:, :c2], shift=1, axis=0) * not_first
    z_next = pltpu.roll(z[:, 2 * c2:], shift=n - 1, axis=0) * not_last
    h2 = jnp.maximum(z_prev + z[:, c2:2 * c2] + z_next + t2_ref[...], 0.0)

    # ---- AdaptiveAvgPool1d(1): per-sample sum over L (1/L folded into fc1 w) ----
    # Note: the reshape is a no-op relayout when L % 8 == 0; for other L it may
    # incur an XLU copy but remains correct.
    pooled = jnp.sum(h2.reshape(tb, L, c2), axis=1)                    # (TB, C2)

    # ---- MLP head (H = 256 lanes: lane-dense) ----
    zz = jnp.dot(pooled.astype(bf16), fc1w_ref[...],
                 preferred_element_type=f32) + fc1b_ref[...]
    zz = jnp.maximum(zz, 0.0)
    o_ref[...] = jnp.dot(zz.astype(bf16), fc2w_ref[...],
                         preferred_element_type=f32) + fc2b_ref[...]


def _pick_tile_and_vmem(block_batch, vmem_limit_bytes):
    """Per-chip defaults: smaller tile / limit on v7x (64 MiB VMEM per TC)."""
    if block_batch is not None and vmem_limit_bytes is not None:
        return block_batch, vmem_limit_bytes
    small_vmem = True
    try:
        small_vmem = pltpu.get_tpu_info().vmem_capacity_bytes <= (64 << 20)
    except Exception:
        small_vmem = True  # unknown -> conservative
    if small_vmem:
        bb, vb = 384, 48 << 20          # v7x-class
    else:
        bb, vb = 512, 80 << 20          # v5e / v6e (128 MiB physical VMEM)
    return (block_batch if block_batch is not None else bb,
            vmem_limit_bytes if vmem_limit_bytes is not None else vb)


def tcn_forward(x, params, *, block_batch=None, vmem_limit_bytes=None):
    """x: (B, n_channels, L) float32 -> (B, output_dim) float32 (eval mode)."""
    (conv1_w, conv1_b, bn1_g, bn1_b, bn1_m, bn1_v,
     conv2_w, conv2_b, bn2_g, bn2_b, bn2_m, bn2_v,
     fc1_w, fc1_b, fc2_w, fc2_b) = params

    B, Cin, L = x.shape
    C1, C2 = conv1_w.shape[0], conv2_w.shape[0]
    H, O = fc1_w.shape[0], fc2_w.shape[0]
    eps = 1e-5
    f32, bf16 = jnp.float32, jnp.bfloat16

    block_batch, vmem_limit_bytes = _pick_tile_and_vmem(block_batch, vmem_limit_bytes)

    # Batch tile: amortize per-grid-step overhead, but keep nb >= 2 for B >= 2 so
    # both TensorCores (v7x megacore) get work via the "parallel" grid axis.
    tb = max(1, min(block_batch, (B + 1) // 2))
    nb = pl.cdiv(B, tb)
    B_pad = nb * tb

    # ---- wrapper-side glue (plain XLA): layout + BN / bias / 1/L folding ----
    xt = jnp.transpose(x, (0, 2, 1)).astype(bf16)          # (B, L, Cin): time on sublanes
    if B_pad > B:
        xt = jnp.pad(xt, ((0, B_pad - B), (0, 0), (0, 0)))
    x_tiles = xt.reshape(nb, tb * L, Cin)                  # no im2col: 1x input HBM traffic

    scale1 = bn1_g / jnp.sqrt(bn1_v + eps)
    shift1 = (conv1_b - bn1_m) * scale1 + bn1_b
    scale2 = bn2_g / jnp.sqrt(bn2_v + eps)
    shift2 = (conv2_b - bn2_m) * scale2 + bn2_b

    # Conv weights as tap-major column blocks [W_prev | W_mid | W_next], BN scale folded.
    # conv_w: (Cout, Cin, 3) -> (Cin, 3, Cout) -> (Cin, 3*Cout); column k*Cout+o.
    w1_all = (jnp.transpose(conv1_w, (1, 2, 0)) * scale1[None, None, :]).reshape(Cin, 3 * C1)
    w2_all = (jnp.transpose(conv2_w, (1, 2, 0)) * scale2[None, None, :]).reshape(C1, 3 * C2)
    # MLP head transposed; fold the 1/L pooling factor into fc1 weights.
    fc1_wt = fc1_w.T.astype(f32) / jnp.asarray(L, f32)
    fc2_wt = fc2_w.T.astype(f32)

    # Advisory cost estimate so XLA schedules the surrounding glue around the call.
    flops = int(2 * B_pad * L * (Cin * 3 * C1 + C1 * 3 * C2)
                + 2 * B_pad * (C2 * H + H * O))
    bytes_accessed = int(B_pad * L * Cin * 2 + B_pad * O * 4
                         + (Cin * 3 * C1 + C1 * 3 * C2 + C2 * H + H * O) * 2
                         + (C1 + C2 + H + O) * 4)
    cost = pl.CostEstimate(flops=flops, transcendentals=0,
                           bytes_accessed=bytes_accessed)

    out = pl.pallas_call(
        functools.partial(tcn_kernel, L=L),
        out_shape=jax.ShapeDtypeStruct((nb, tb, O), f32),
        grid_spec=pltpu.PrefetchScalarGridSpec(
            num_scalar_prefetch=0,
            grid=(nb,),
            in_specs=[
                # leading size-1 dims squeezed (None) -> kernel sees 2D refs
                pl.BlockSpec((None, tb * L, Cin), lambda b: (b, 0, 0)),
                pl.BlockSpec((Cin, 3 * C1), lambda b: (0, 0)),
                pl.BlockSpec((1, C1), lambda b: (0, 0)),
                pl.BlockSpec((C1, 3 * C2), lambda b: (0, 0)),
                pl.BlockSpec((1, C2), lambda b: (0, 0)),
                pl.BlockSpec((C2, H), lambda b: (0, 0)),
                pl.BlockSpec((1, H), lambda b: (0, 0)),
                pl.BlockSpec((H, O), lambda b: (0, 0)),
                pl.BlockSpec((1, O), lambda b: (0, 0)),
            ],
            out_specs=pl.BlockSpec((None, tb, O), lambda b: (b, 0, 0)),
        ),
        compiler_params=pltpu.CompilerParams(
            dimension_semantics=("parallel",),
            vmem_limit_bytes=int(vmem_limit_bytes)),
        cost_estimate=cost,
    )(x_tiles,
      w1_all.astype(bf16), shift1[None, :].astype(f32),
      w2_all.astype(bf16), shift2[None, :].astype(f32),
      fc1_wt.astype(bf16), fc1_b[None, :].astype(f32),
      fc2_wt.astype(bf16), fc2_b[None, :].astype(f32))

    return out.reshape(B_pad, O)[:B]


def tcn_reference(x, params):
    """Pure-JAX eval-mode reference mirroring the PyTorch module (f32)."""
    (conv1_w, conv1_b, bn1_g, bn1_b, bn1_m, bn1_v,
     conv2_w, conv2_b, bn2_g, bn2_b, bn2_m, bn2_v,
     fc1_w, fc1_b, fc2_w, fc2_b) = params
    eps = 1e-5
    L = x.shape[2]

    def conv1d(x, w, b):
        xp = jnp.pad(x, ((0, 0), (0, 0), (1, 1)))
        y = sum(jnp.einsum('oc,bct->bot', w[:, :, k], xp[:, :, k:k + L])
                for k in range(3))
        return y + b[None, :, None]

    def bn(x, g, bt, m, v):
        return (x - m[None, :, None]) / jnp.sqrt(v[None, :, None] + eps) \
            * g[None, :, None] + bt[None, :, None]

    h = jax.nn.relu(bn(conv1d(x, conv1_w, conv1_b), bn1_g, bn1_b, bn1_m, bn1_v))
    h = jax.nn.relu(bn(conv1d(h, conv2_w, conv2_b), bn2_g, bn2_b, bn2_m, bn2_v))
    p = jnp.mean(h, axis=2)
    z = jax.nn.relu(p @ fc1_w.T + fc1_b)
    return z @ fc2_w.T + fc2_b


def make_params(key, n_channels=4, hidden_dim=256, output_dim=4):
    ks = jax.random.split(key, 16)
    f32 = jnp.float32
    conv1_w = (jax.random.normal(ks[0], (32, n_channels, 3)) * 0.1).astype(f32)
    conv1_b = (jax.random.normal(ks[1], (32,)) * 0.1).astype(f32)
    bn1_g = (1.0 + jax.random.normal(ks[2], (32,)) * 0.1).astype(f32)
    bn1_b = (jax.random.normal(ks[3], (32,)) * 0.1).astype(f32)
    bn1_m = (jax.random.normal(ks[4], (32,)) * 0.1).astype(f32)
    bn1_v = jax.random.uniform(ks[5], (32,), minval=0.5, maxval=1.5).astype(f32)
    conv2_w = (jax.random.normal(ks[6], (64, 32, 3)) * 0.05).astype(f32)
    conv2_b = (jax.random.normal(ks[7], (64,)) * 0.1).astype(f32)
    bn2_g = (1.0 + jax.random.normal(ks[8], (64,)) * 0.1).astype(f32)
    bn2_b = (jax.random.normal(ks[9], (64,)) * 0.1).astype(f32)
    bn2_m = (jax.random.normal(ks[10], (64,)) * 0.1).astype(f32)
    bn2_v = jax.random.uniform(ks[11], (64,), minval=0.5, maxval=1.5).astype(f32)
    fc1_w = (jax.random.normal(ks[12], (hidden_dim, 64)) * 0.05).astype(f32)
    fc1_b = (jax.random.normal(ks[13], (hidden_dim,)) * 0.1).astype(f32)
    fc2_w = (jax.random.normal(ks[14], (output_dim, hidden_dim)) * 0.05).astype(f32)
    fc2_b = (jax.random.normal(ks[15], (output_dim,)) * 0.1).astype(f32)
    return (conv1_w, conv1_b, bn1_g, bn1_b, bn1_m, bn1_v,
            conv2_w, conv2_b, bn2_g, bn2_b, bn2_m, bn2_v,
            fc1_w, fc1_b, fc2_w, fc2_b)


if __name__ == "__main__":
    key = jax.random.PRNGKey(0)
    pkey, xkey = jax.random.split(key)

    batch, n_channels, window = 2, 4, 16
    params = make_params(pkey, n_channels=n_channels, hidden_dim=256, output_dim=4)
    x = jax.random.normal(xkey, (batch, n_channels, window), dtype=jnp.float32)

    y = jax.block_until_ready(tcn_forward(x, params))
    y_ref = jax.block_until_ready(tcn_reference(x, params))

    assert y.shape == (batch, 4), y.shape
    # bf16 matmul operands (f32 accumulation) -> tolerance loosened vs f32-only path.
    assert jnp.allclose(y, y_ref, atol=4e-2, rtol=4e-2), (y, y_ref)
    print("KERNEL_OK")
</pallas_src>

<mosaic_0001>
module attributes {stable_mosaic.version = 11 : i64} {
  func.func @tcn_kernel(%arg0: i32, %arg1: memref<1x16x4xbf16, #tpu.memory_space<vmem>>, %arg2: memref<4x96xbf16, #tpu.memory_space<vmem>>, %arg3: memref<1x32xf32, #tpu.memory_space<vmem>>, %arg4: memref<32x192xbf16, #tpu.memory_space<vmem>>, %arg5: memref<1x64xf32, #tpu.memory_space<vmem>>, %arg6: memref<64x256xbf16, #tpu.memory_space<vmem>>, %arg7: memref<1x256xf32, #tpu.memory_space<vmem>>, %arg8: memref<256x4xbf16, #tpu.memory_space<vmem>>, %arg9: memref<1x4xf32, #tpu.memory_space<vmem>>, %arg10: memref<1x1x4xf32, #tpu.memory_space<vmem>>) attributes {dimension_semantics = [#tpu.dimension_semantics<parallel>], iteration_bounds = array<i64: 2>, scalar_prefetch = 0 : i64, scratch_operands = 0 : i64, tpu.core_type = #tpu.core_type<tc>, window_params = [{transform_indices = @transform_0, window_bounds = array<i64: 1, 16, 4>}, {pipeline_mode = #tpu.pipeline_mode<synchronous>, transform_indices = @transform_1, window_bounds = array<i64: 4, 96>}, {pipeline_mode = #tpu.pipeline_mode<synchronous>, transform_indices = @transform_2, window_bounds = array<i64: 1, 32>}, {pipeline_mode = #tpu.pipeline_mode<synchronous>, transform_indices = @transform_3, window_bounds = array<i64: 32, 192>}, {pipeline_mode = #tpu.pipeline_mode<synchronous>, transform_indices = @transform_4, window_bounds = array<i64: 1, 64>}, {pipeline_mode = #tpu.pipeline_mode<synchronous>, transform_indices = @transform_5, window_bounds = array<i64: 64, 256>}, {pipeline_mode = #tpu.pipeline_mode<synchronous>, transform_indices = @transform_6, window_bounds = array<i64: 1, 256>}, {pipeline_mode = #tpu.pipeline_mode<synchronous>, transform_indices = @transform_7, window_bounds = array<i64: 256, 4>}, {pipeline_mode = #tpu.pipeline_mode<synchronous>, transform_indices = @transform_8, window_bounds = array<i64: 1, 4>}, {transform_indices = @transform_9, window_bounds = array<i64: 1, 1, 4>}]} {
    %0 = tpu.iota {dimensions = array<i32: 0>} : vector<16x1xi32>
    %1 = arith.sitofp %0 : vector<16x1xi32> to vector<16x1xf32>
    %cst = arith.constant 5.000000e-01 : f32
    %2 = vector.broadcast %cst : f32 to vector<16x1xf32>
    %3 = arith.addf %1, %2 : vector<16x1xf32>
    %cst_0 = arith.constant 6.250000e-02 : f32
    %4 = vector.broadcast %cst_0 : f32 to vector<16x1xf32>
    %5 = arith.mulf %3, %4 : vector<16x1xf32>
    %6 = math.floor %5 : vector<16x1xf32>
    %cst_1 = arith.constant 1.600000e+01 : f32
    %7 = vector.broadcast %cst_1 : f32 to vector<16x1xf32>
    %8 = arith.mulf %6, %7 : vector<16x1xf32>
    %9 = arith.subf %1, %8 : vector<16x1xf32>
    %cst_2 = arith.constant 5.000000e-01 : f32
    %10 = vector.broadcast %cst_2 : f32 to vector<16x1xf32>
    %11 = arith.cmpf ogt, %9, %10 : vector<16x1xf32>
    %12 = arith.extui %11 : vector<16x1xi1> to vector<16x1xi32>
    %13 = arith.sitofp %12 : vector<16x1xi32> to vector<16x1xf32>
    %cst_3 = arith.constant 1.450000e+01 : f32
    %14 = vector.broadcast %cst_3 : f32 to vector<16x1xf32>
    %15 = arith.cmpf olt, %9, %14 : vector<16x1xf32>
    %16 = arith.extui %15 : vector<16x1xi1> to vector<16x1xi32>
    %17 = arith.sitofp %16 : vector<16x1xi32> to vector<16x1xf32>
    %c0 = arith.constant 0 : index
    %c0_4 = arith.constant 0 : index
    %c0_5 = arith.constant 0 : index
    %18 = vector.load %arg1[%c0, %c0_4, %c0_5] : memref<1x16x4xbf16, #tpu.memory_space<vmem>>, vector<1x16x4xbf16>
    %19 = vector.shape_cast %18 : vector<1x16x4xbf16> to vector<16x4xbf16>
    %c0_6 = arith.constant 0 : index
    %c0_7 = arith.constant 0 : index
    %20 = vector.load %arg2[%c0_6, %c0_7] : memref<4x96xbf16, #tpu.memory_space<vmem>>, vector<4x96xbf16>
    %cst_8 = arith.constant dense<0.000000e+00> : vector<16x96xf32>
    %21 = tpu.matmul %19, %20, %cst_8 {dimension_numbers = #tpu.dot_dimension_numbers<[1], [0], [0], [1], [0, 0, 1, 1], [], []>} : vector<16x4xbf16>, vector<4x96xbf16>, vector<16x96xf32> -> vector<16x96xf32>
    %22 = vector.extract_strided_slice %21 {offsets = [0, 0], sizes = [16, 32], strides = [1, 1]} : vector<16x96xf32> to vector<16x32xf32>
    %c1_i32 = arith.constant 1 : i32
    %23 = tpu.dynamic_rotate %22 by %c1_i32 dim 0 : vector<16x32xf32>, i32 -> vector<16x32xf32>
    %24 = vector.broadcast %13 : vector<16x1xf32> to vector<16x32xf32>
    %25 = arith.mulf %23, %24 : vector<16x32xf32>
    %26 = vector.extract_strided_slice %21 {offsets = [0, 64], sizes = [16, 32], strides = [1, 1]} : vector<16x96xf32> to vector<16x32xf32>
    %c15_i32 = arith.constant 15 : i32
    %27 = tpu.dynamic_rotate %26 by %c15_i32 dim 0 : vector<16x32xf32>, i32 -> vector<16x32xf32>
    %28 = vector.broadcast %17 : vector<16x1xf32> to vector<16x32xf32>
    %29 = arith.mulf %27, %28 : vector<16x32xf32>
    %30 = vector.extract_strided_slice %21 {offsets = [0, 32], sizes = [16, 32], strides = [1, 1]} : vector<16x96xf32> to vector<16x32xf32>
    %31 = arith.addf %25, %30 : vector<16x32xf32>
    %32 = arith.addf %31, %29 : vector<16x32xf32>
    %c0_9 = arith.constant 0 : index
    %c0_10 = arith.constant 0 : index
    %33 = vector.load %arg3[%c0_9, %c0_10] : memref<1x32xf32, #tpu.memory_space<vmem>>, vector<1x32xf32>
    %34 = vector.broadcast %33 : vector<1x32xf32> to vector<16x32xf32>
    %35 = arith.addf %32, %34 : vector<16x32xf32>
    %cst_11 = arith.constant 0.000000e+00 : f32
    %36 = vector.broadcast %cst_11 : f32 to vector<16x32xf32>
    %37 = arith.maximumf %35, %36 : vector<16x32xf32>
    %38 = arith.truncf %37 : vector<16x32xf32> to vector<16x32xbf16>
    %c0_12 = arith.constant 0 : index
    %c0_13 = arith.constant 0 : index
    %39 = vector.load %arg4[%c0_12, %c0_13] : memref<32x192xbf16, #tpu.memory_space<vmem>>, vector<32x192xbf16>
    %cst_14 = arith.constant dense<0.000000e+00> : vector<16x192xf32>
    %40 = tpu.matmul %38, %39, %cst_14 {dimension_numbers = #tpu.dot_dimension_numbers<[1], [0], [0], [1], [0, 0, 1, 1], [], []>} : vector<16x32xbf16>, vector<32x192xbf16>, vector<16x192xf32> -> vector<16x192xf32>
    %41 = vector.extract_strided_slice %40 {offsets = [0, 0], sizes = [16, 64], strides = [1, 1]} : vector<16x192xf32> to vector<16x64xf32>
    %c1_i32_15 = arith.constant 1 : i32
    %42 = tpu.dynamic_rotate %41 by %c1_i32_15 dim 0 : vector<16x64xf32>, i32 -> vector<16x64xf32>
    %43 = vector.broadcast %13 : vector<16x1xf32> to vector<16x64xf32>
    %44 = arith.mulf %42, %43 : vector<16x64xf32>
    %45 = vector.extract_strided_slice %40 {offsets = [0, 128], sizes = [16, 64], strides = [1, 1]} : vector<16x192xf32> to vector<16x64xf32>
    %c15_i32_16 = arith.constant 15 : i32
    %46 = tpu.dynamic_rotate %45 by %c15_i32_16 dim 0 : vector<16x64xf32>, i32 -> vector<16x64xf32>
    %47 = vector.broadcast %17 : vector<16x1xf32> to vector<16x64xf32>
    %48 = arith.mulf %46, %47 : vector<16x64xf32>
    %49 = vector.extract_strided_slice %40 {offsets = [0, 64], sizes = [16, 64], strides = [1, 1]} : vector<16x192xf32> to vector<16x64xf32>
    %50 = arith.addf %44, %49 : vector<16x64xf32>
    %51 = arith.addf %50, %48 : vector<16x64xf32>
    %c0_17 = arith.constant 0 : index
    %c0_18 = arith.constant 0 : index
    %52 = vector.load %arg5[%c0_17, %c0_18] : memref<1x64xf32, #tpu.memory_space<vmem>>, vector<1x64xf32>
    %53 = vector.broadcast %52 : vector<1x64xf32> to vector<16x64xf32>
    %54 = arith.addf %51, %53 : vector<16x64xf32>
    %cst_19 = arith.constant 0.000000e+00 : f32
    %55 = vector.broadcast %cst_19 : f32 to vector<16x64xf32>
    %56 = arith.maximumf %54, %55 : vector<16x64xf32>
    %57 = vector.shape_cast %56 : vector<16x64xf32> to vector<1x16x64xf32>
    %cst_20 = arith.constant dense<0.000000e+00> : vector<1x64xf32>
    %58 = vector.multi_reduction <add>, %57, %cst_20 [1] : vector<1x16x64xf32> to vector<1x64xf32>
    %59 = arith.truncf %58 : vector<1x64xf32> to vector<1x64xbf16>
    %c0_21 = arith.constant 0 : index
    %c0_22 = arith.constant 0 : index
    %60 = vector.load %arg6[%c0_21, %c0_22] : memref<64x256xbf16, #tpu.memory_space<vmem>>, vector<64x256xbf16>
    %cst_23 = arith.constant dense<0.000000e+00> : vector<1x256xf32>
    %61 = tpu.matmul %59, %60, %cst_23 {dimension_numbers = #tpu.dot_dimension_numbers<[1], [0], [0], [1], [0, 0, 1, 1], [], []>} : vector<1x64xbf16>, vector<64x256xbf16>, vector<1x256xf32> -> vector<1x256xf32>
    %c0_24 = arith.constant 0 : index
    %c0_25 = arith.constant 0 : index
    %62 = vector.load %arg7[%c0_24, %c0_25] : memref<1x256xf32, #tpu.memory_space<vmem>>, vector<1x256xf32>
    %63 = arith.addf %61, %62 : vector<1x256xf32>
    %cst_26 = arith.constant 0.000000e+00 : f32
    %64 = vector.broadcast %cst_26 : f32 to vector<1x256xf32>
    %65 = arith.maximumf %63, %64 : vector<1x256xf32>
    %66 = arith.truncf %65 : vector<1x256xf32> to vector<1x256xbf16>
    %c0_27 = arith.constant 0 : index
    %c0_28 = arith.constant 0 : index
    %67 = vector.load %arg8[%c0_27, %c0_28] : memref<256x4xbf16, #tpu.memory_space<vmem>>, vector<256x4xbf16>
    %cst_29 = arith.constant dense<0.000000e+00> : vector<1x4xf32>
    %68 = tpu.matmul %66, %67, %cst_29 {dimension_numbers = #tpu.dot_dimension_numbers<[1], [0], [0], [1], [0, 0, 1, 1], [], []>} : vector<1x256xbf16>, vector<256x4xbf16>, vector<1x4xf32> -> vector<1x4xf32>
    %c0_30 = arith.constant 0 : index
    %c0_31 = arith.constant 0 : index
    %69 = vector.load %arg9[%c0_30, %c0_31] : memref<1x4xf32, #tpu.memory_space<vmem>>, vector<1x4xf32>
    %70 = arith.addf %68, %69 : vector<1x4xf32>
    %c0_32 = arith.constant 0 : index
    %c0_33 = arith.constant 0 : index
    %c0_34 = arith.constant 0 : index
    %71 = vector.load %arg10[%c0_32, %c0_33, %c0_34] : memref<1x1x4xf32, #tpu.memory_space<vmem>>, vector<1x1x4xf32>
    %72 = vector.shape_cast %71 : vector<1x1x4xf32> to vector<1x4xf32>
    %73 = vector.shape_cast %70 : vector<1x4xf32> to vector<1x1x4xf32>
    tpu.vector_store %arg10[%c0_32, %c0_33, %c0_34], %73 {strides = array<i32>} : memref<1x1x4xf32, #tpu.memory_space<vmem>>, vector<1x1x4xf32>,
    return
  }
  func.func @transform_0(%arg0: i32) -> (i32, i32, i32) {
    %c0_i32 = arith.constant 0 : i32
    %c0_i32_0 = arith.constant 0 : i32
    %c0_i32_1 = arith.constant 0 : i32
    return %arg0, %c0_i32, %c0_i32_0 : i32, i32, i32
  }
  func.func @transform_1(%arg0: i32) -> (i32, i32) {
    %c0_i32 = arith.constant 0 : i32
    %c0_i32_0 = arith.constant 0 : i32
    %c0_i32_1 = arith.constant 0 : i32
    return %c0_i32, %c0_i32_0 : i32, i32
  }
  func.func @transform_2(%arg0: i32) -> (i32, i32) {
    %c0_i32 = arith.constant 0 : i32
    %c0_i32_0 = arith.constant 0 : i32
    %c0_i32_1 = arith.constant 0 : i32
    return %c0_i32, %c0_i32_0 : i32, i32
  }
  func.func @transform_3(%arg0: i32) -> (i32, i32) {
    %c0_i32 = arith.constant 0 : i32
    %c0_i32_0 = arith.constant 0 : i32
    %c0_i32_1 = arith.constant 0 : i32
    return %c0_i32, %c0_i32_0 : i32, i32
  }
  func.func @transform_4(%arg0: i32) -> (i32, i32) {
    %c0_i32 = arith.constant 0 : i32
    %c0_i32_0 = arith.constant 0 : i32
    %c0_i32_1 = arith.constant 0 : i32
    return %c0_i32, %c0_i32_0 : i32, i32
  }
  func.func @transform_5(%arg0: i32) -> (i32, i32) {
    %c0_i32 = arith.constant 0 : i32
    %c0_i32_0 = arith.constant 0 : i32
    %c0_i32_1 = arith.constant 0 : i32
    return %c0_i32, %c0_i32_0 : i32, i32
  }
  func.func @transform_6(%arg0: i32) -> (i32, i32) {
    %c0_i32 = arith.constant 0 : i32
    %c0_i32_0 = arith.constant 0 : i32
    %c0_i32_1 = arith.constant 0 : i32
    return %c0_i32, %c0_i32_0 : i32, i32
  }
  func.func @transform_7(%arg0: i32) -> (i32, i32) {
    %c0_i32 = arith.constant 0 : i32
    %c0_i32_0 = arith.constant 0 : i32
    %c0_i32_1 = arith.constant 0 : i32
    return %c0_i32, %c0_i32_0 : i32, i32
  }
  func.func @transform_8(%arg0: i32) -> (i32, i32) {
    %c0_i32 = arith.constant 0 : i32
    %c0_i32_0 = arith.constant 0 : i32
    %c0_i32_1 = arith.constant 0 : i32
    return %c0_i32, %c0_i32_0 : i32, i32
  }
  func.func @transform_9(%arg0: i32) -> (i32, i32, i32) {
    %c0_i32 = arith.constant 0 : i32
    %c0_i32_0 = arith.constant 0 : i32
    %c0_i32_1 = arith.constant 0 : i32
    return %arg0, %c0_i32, %c0_i32_0 : i32, i32, i32
  }
}

</mosaic_0001>

<bundles_post_ra>
// kernel: tpu_custom_call.1
= control target key start
LH: loop header
LB: loop body
LE: loop exit
PB: predicated region body
PF: predicated region fallthrough
CT: control target
= control target key end

     0   :  { %14 = vsyncpa [#allocation3], 0  ;;  %s1440_s0 = inlined_call_operand.vmem [shape: bf16[2,16,4], index: 0, kind: input, shape index: {}]   ;;  %s1441_s1 = inlined_call_operand.vmem [shape: bf16[4,96], index: 1, kind: input, shape index: {}]   ;;  %s1442_s2 = inlined_call_operand.vmem [shape: f32[1,32], index: 2, kind: input, shape index: {}]   ;;  %s1443_s3 = inlined_call_operand.vmem [shape: bf16[32,192], index: 3, kind: input, shape index: {}]   ;;  %s1444_s4 = inlined_call_operand.vmem [shape: f32[1,64], index: 4, kind: input, shape index: {}]   ;;  %s1445_s5 = inlined_call_operand.vmem [shape: bf16[64,256], index: 5, kind: input, shape index: {}]   ;;  %s1446_s6 = inlined_call_operand.vmem [shape: f32[1,256], index: 6, kind: input, shape index: {}]   ;;  %s1447_s7 = inlined_call_operand.vmem [shape: bf16[256,4], index: 7, kind: input, shape index: {}]   ;;  %s1448_s8 = inlined_call_operand.vmem [shape: f32[1,4], index: 8, kind: input, shape index: {}]   ;;  %s1449_s9 = inlined_call_operand.hbm [shape: f32[2,1,4], index: 9, kind: output, shape index: {}]  }
   0x1   :  { %16 = vsyncpa [#allocation3 + $0x1], 0  ;;  %s1198_s30 = smov 0   ;;  %s1200_s10 = smov 0  }
   0x2   :  { %s1202_s11 = smov 0   ;;  %s1204_s12 = smov 0  }
   0x3 LB: > { %s1219_s13 = sadd.s32 4294967295, %s1140_s12   ;;  %s923_s14 = sadd.s32 4294967294, %s1140_s12   ;;  %s1140_s12 = sphi %s1204_s12, %s1455_s12   ;;  %s1136_s11 = sphi %s1202_s11, %s1454_s11   ;;  %s1132_s10 = sphi %s1200_s10, %s1453_s10   ;;  %s1128_s30 = sphi %s1198_s30, %s1452_s30  }
   0x4   : > { %s1223_s15 = sadd.s32 1, %s1140_s12   ;;  %s223_s16 = sadd.s32 1, %s1136_s11 }
   0x5   : > { %s220_s17 = ssub.s32 %s1140_s12, %s1223_s15  ;;  %p233_p0 = scmp.ne.s32.totalorder %s1136_s11, %s1132_s10 }
   0x6   : > { %p221_p1 = scmp.eq.s32.totalorder %s220_s17, 0  ;;  %p234_p2 = scmp.eq.s32.totalorder %s1219_s13, 1 }
   0x7   : > { %p239_p3 = scmp.ne.s32.totalorder %s1132_s10, %s1128_s30  ;;  %p240_p4 = scmp.eq.s32.totalorder %s923_s14, 1 }
   0x8   : > { %s1234_s18 = scalar_select %p221_p1, %s1136_s11, %s223_s16  }
   0x9   : > { %p1236_p5 = por %p234_p2, %p233_p0  ;;  %p1240_p6 = por %p240_p4, %p239_p3 }
   0xa   : > { %p926_p7 = scmp.ge.s32.totalorder %s1140_s12, 1  ;;  %p290_p8 = scmp.lt.s32.totalorder %s1140_s12, 3 }
   0xc   : > { %p291_p9 = pnand %p926_p7, %p290_p8 }
   0xd   : > { %p325_p10 = scmp.lt.s32.totalorder (!%p291_p9), %s1219_s13, 1  ;;  %s1145_s25 = smov (!%p291_p9), 64  }
   0xe   : > { %294 = sbr.rel (%p291_p9) target bundleno = 1100 (0x44c), region = 56 }
  0x13   : > { %v360_v0 = vld [vmem:[%s1441_s1] sm:$0x3]  ;;  %vm370_vm0 = vcmask 1041408   ;;  %v1142_v1 = vmov 0.0   ;;  %vm1143_vm1 = vmmov 0   ;;  %s326_s23 = scalar_select %p325_p10, %s1219_s13, 1  ;;  %v331_v6 = vlaneseq }
  0x14   : > { %995 = vmatprep.subr.bf16.mxu0 %v1142_v1  ;;  %v372_v2 = vsel %vm370_vm0, %v360_v0, 0  ;;  %997 = vmatprep.mubr.msk.bf16.mxu0 %vm1143_vm1, %v1142_v1  ;;  %vm366_vm2 = vcmask 31744   ;;  %v1048_v4 = vld [vmem:[%s1443_s3 + $0x14] ss:$8 sps:$4 sm:$0xff]   ;;  %v1046_v5 = vld [vmem:[%s1443_s3 + $0x10] ss:$8 sps:$4 sm:$0xff]  }
  0x15   : > { %996 = vmatpush3.bf16.msra.mxu0 %v372_v2  ;;  %s970_s24 = sshll.u32 %s326_s23, 3  ;;  %v1051_v7 = vld [vmem:[%s1443_s3 + $0x4] ss:$8 sps:$4 sm:$0xff]   ;;  %v1049_v9 = vld [vmem:[%s1443_s3] ss:$8 sps:$4 sm:$0xff]   ;;  %v1269_v11 = vshrl.u32 %v331_v6, 7 }
  0x16   : > { %s329_s27 = scalar_lea.vmem %s1440_s0, %s970_s24  ;;  %499 = vmatprep.subr.bf16.mxu0 %v1048_v4  ;;  %s1144_s24 = smov 96   ;;  %v1146_v12 = vmov 0   ;;  %v935_v50 = vld [vmem:[%s1442_s2] ss:$0 sm:$0xff]  ;;  %vm483_vm9 = vcmask 261120   ;;  %vm565_vm10 = vcmask 523264  }
  0x17   : > { %v1045_v3 = vld [vmem:[%s329_s27] sm:$0xff]   ;;  %vm417_vm3 = vcmp.lt.s32.totalorder %v1269_v11, 1  ;;  %v333_v19 = vadd.s32 8, %v1269_v11  ;;  %v334_v20 = vcvt.s32.f32 %v1269_v11  ;;  %vm432_vm8 = vcmp.lt.s32.totalorder %v1269_v11, 7  ;;  %v1052_v58 = vld [vmem:[%s1445_s5 + $0x30] ss:$8 sps:$4 sm:$0xff]  }
  0x18   : > { %998 = vmatmul.mubr.msk.bf16.vlgmr.msra.gmra.mxu0 %vm366_vm2, %v1045_v3  ;;  %v1054_v59 = vld [vmem:[%s1445_s5 + $0x34] ss:$8 sps:$4 sm:$0xff]   ;;  %v1057_v60 = vld [vmem:[%s1445_s5 + $0x24] ss:$8 sps:$4 sm:$0xff]   ;;  %v1055_v62 = vld [vmem:[%s1445_s5 + $0x20] ss:$8 sps:$4 sm:$0xff]  }
  0x19   : > { %500 = vmatpush1.bf16.msra.mxu0 %v1046_v5  ;;  %519 = vmatprep.mubr.bf16.mxu0 %v1146_v12  ;;  %v335_v21 = vcvt.s32.f32 %v333_v19  ;;  %v336_v22 = vadd.f32 0.5, %v334_v20  ;;  %v1060_v0 = vld [vmem:[%s1445_s5 + $0x14] ss:$8 sps:$4 sm:$0xff]   ;;  %v1058_v4 = vld [vmem:[%s1445_s5 + $0x10] ss:$8 sps:$4 sm:$0xff]   ;;  %s967_s23 = sshll.u32 %s1219_s13, 4 }
  0x1a   : > { %501 = vmatprep.subr.bf16.mxu0 %v1051_v7  ;;  %v1063_v5 = vld [vmem:[%s1445_s5 + $0x4] ss:$8 sps:$4 sm:$0xff]   ;;  %v1073_v19 = vld [vmem:[%s1447_s7 + $0x18] sm:$0xff]   ;;  %vm853_vm11 = vcmask 24576   ;;  %s1405_s29 = scalar_lea.hbm %s1449_s9, %s967_s23  ;;  %s1147_s13 = smov [#allocation2]  }
  0x1b   : > { %v337_v23 = vadd.f32 0.5, %v335_v21  ;;  %v338_v24 = vmul.f32 0.0625, %v336_v22  ;;  %s1084_s17 = sshll.u32 %s1147_s13, 4  ;;  %s1085_s17 = int_to_ptr.vmem [resolvable:$false] %s1084_s17 }
  0x1c   : > { %s1086_s21 = scalar_lea.vmem %s1085_s17, 32 }
  0x1d   : > { %502 = vmatpush1.bf16.msra.mxu0 %v1049_v9  ;;  %v339_v25 = vmul.f32 0.0625, %v337_v23  ;;  %v340_v26 = vfloor.f32 %v338_v24  ;;  %v1064_v9 = vld [vmem:[%s1447_s7 + $0x78] sm:$0xff]  }
  0x1e   : > { %647 = vmatprep.subr.bf16.mxu0 %v1054_v59  ;;  %973 = vmatprep.subr.bf16.mxu1 %v1064_v9 }
  0x1f   : > { %v341_v27 = vfloor.f32 %v339_v25  ;;  %v342_v28 = vmul.f32 16.0, %v340_v26 }
  0x21   : > { %v343_v29 = vmul.f32 16.0, %v341_v27  ;;  %v344_v30 = vsub.f32 %v334_v20, %v342_v28  ;;  %v1074_v20 = vld [vmem:[%s1447_s7 + $0x50] sm:$0xff]  }
  0x23   : > { %v345_v31 = vsub.f32 %v335_v21, %v343_v29  ;;  %vm346_vm4 = vcmp.gt.f32.partialorder %v344_v30, 0.5  ;;  %vm352_vm6 = vcmp.lt.f32.partialorder %v344_v30, 14.5  ;;  %v1075_v21 = vld [vmem:[%s1447_s7 + $0x10] sm:$0xff]  }
  0x24   : > { %v1280_v34 = vsel %vm346_vm4, 1.0, %v1142_v1  ;;  %v1287_v39 = vsel %vm352_vm6, 1.0, %v1142_v1 }
  0x25   : > { %vm347_vm5 = vcmp.gt.f32.partialorder %v345_v31, 0.5  ;;  %vm353_vm7 = vcmp.lt.f32.partialorder %v345_v31, 14.5  ;;  %v941_v31 = vld [vmem:[%s1444_s4] ss:$0 sm:$0xff] }
  0x26   : > { %v1283_v35 = vsel %vm347_vm5, 1.0, %v1142_v1  ;;  %v1290_v40 = vsel %vm353_vm7, 1.0, %v1142_v1 }
  0xd8   : > { %v408_v8 = vpop.f32.mrf.mxu0 }
  0xd9   : > { %437 = vrot.lane.b32.xlu1 %v408_v8, %s1144_s24  ;;  %424 = vrot.lane.b32.xlu0 %v408_v8, %s1145_s25  ;;  %v415_v14 = vrot.slane %v408_v8, 7  ;;  %v1061_v8 = vld [vmem:[%s1445_s5] ss:$8 sps:$4 sm:$0xff]  }
  0xda   : > { %v999_v10 = vpop.f32.mrf.mxu0 }
  0xdb   : > { %v1065_v10 = vld [vmem:[%s1447_s7 + $0x38] sm:$0xff]  }
  0xdc   : > { %v411_v13 = vpop.f32.mrf.mxu0  ;;  %974 = vmatpush3.bf16.msra.mxu1 %v1065_v10 }
  0xdd   : > { %v416_v15 = vrot.slane %v411_v13, 7  ;;  %439 = vrot.lane.b32.xlu1 %v411_v13, %s1144_s24  ;;  %426 = vrot.lane.b32.xlu0 %v411_v13, %s1145_s25  ;;  %v1067_v13 = vld [vmem:[%s1447_s7 + $0x30] sm:$0xff]  }
  0xde   : > { %v1000_v16 = vpop.f32.mrf.mxu0 }
  0xdf   : > { %v419_v17 = vsel %vm417_vm3, %v416_v15, %v415_v14  ;;  %v418_v18 = vsel %vm417_vm3, %v415_v14, %v416_v15  ;;  %v1068_v14 = vld [vmem:[%s1447_s7 + $0x68] sm:$0xff]   ;;  %v1070_v16 = vld [vmem:[%s1447_s7 + $0x60] sm:$0xff]  }
  0xe0   : > { %v420_v42 = vmul.f32 %v1280_v34, %v419_v17  ;;  %v421_v43 = vmul.f32 %v1283_v35, %v418_v18  ;;  %v1069_v15 = vld [vmem:[%s1447_s7 + $0x28] sm:$0xff]   ;;  %v1071_v17 = vld [vmem:[%s1447_s7 + $0x20] sm:$0xff]   ;;  %v1072_v18 = vld [vmem:[%s1447_s7 + $0x58] sm:$0xff]  }
 0x14b   : > { %v438_v32 = vpop.permute.xlu1 %437  ;;  %v425_v33 = vpop.permute.xlu0 %424 }
 0x14c   : > { %v430_v37 = vrot.slane %v425_v33, 1  ;;  %v443_v46 = vadd.f32 %v438_v32, %v420_v42 }
 0x14f   : > { %v427_v36 = vpop.permute.xlu0 %426  ;;  %v440_v38 = vpop.permute.xlu1 %439 }
 0x150   : > { %v431_v41 = vrot.slane %v427_v36, 1  ;;  %v444_v47 = vadd.f32 %v440_v38, %v421_v43 }
 0x152   : > { %v433_v44 = vsel %vm432_vm8, %v430_v37, %v431_v41  ;;  %v434_v45 = vsel %vm432_vm8, %v431_v41, %v430_v37 }
 0x153   : > { %v435_v48 = vmul.f32 %v1287_v39, %v433_v44  ;;  %v436_v49 = vmul.f32 %v1290_v40, %v434_v45 }
 0x155   : > { %v445_v51 = vadd.f32 %v443_v46, %v435_v48  ;;  %v446_v52 = vadd.f32 %v444_v47, %v436_v49 }
 0x157   : > { %v454_v53 = vadd.f32 %v935_v50, %v445_v51  ;;  %v455_v54 = vadd.f32 %v935_v50, %v446_v52 }
 0x159   : > { %v456_v55 = vmax.f32 %v454_v53, 0.0  ;;  %v457_v56 = vmax.f32 %v455_v54, 0.0  ;;  %v1077_v53 = vld [vmem:[%s1447_s7 + $0x8] sm:$0xff]   ;;  %v1078_v54 = vld [vmem:[%s1447_s7 + $0x40] sm:$0xff]  }
 0x15b   : > { %v458_v57 = vpack.c.bf16 %v457_v56, %v456_v55  ;;  %v1079_v55 = vld [vmem:[%s1447_s7] sm:$0xff]   ;;  %v628_v56 = vsub.s32 0, %v1269_v11 }
 0x15d   : > { %940 = vmatmul.mubr.msk.bf16.vlgmr.msra.gmra.mxu0 %vm483_vm9, %v458_v57  ;;  %v584_v57 = vld [vmem:[%s1446_s6] sm:$0x3] }
 0x15e   : > { %671 = vmatprep.mubr.bf16.mxu0 %v1146_v12  ;;  %648 = vmatpush1.bf16.msra.mxu0 %v1052_v58  ;;  %v1066_v12 = vld [vmem:[%s1447_s7 + $0x70] sm:$0xff]   ;;  %v632_v58 = vsub.s32 1, %v1269_v11  ;;  %v629_v59 = vrot.slane %v584_v57, %v628_v56  ;;  %v716_v11 = vld [vmem:[%s1448_s8] sm:$0x1] }
 0x15f   : > { %649 = vmatprep.subr.bf16.mxu0 %v1057_v60  ;;  %975 = vmatprep.subr.bf16.mxu1 %v1066_v12 }
 0x160   : > { %976 = vmatpush3.bf16.msra.mxu1 %v1067_v13  ;;  %v633_v60 = vrot.slane %v584_v57, %v632_v58 }
 0x161   : > { %977 = vmatprep.subr.bf16.mxu1 %v1068_v14 }
 0x162   : > { %650 = vmatpush1.bf16.msra.mxu0 %v1055_v62 }
 0x163   : > { %651 = vmatprep.subr.bf16.mxu0 %v1060_v0 }
 0x164   : > { %978 = vmatpush3.bf16.msra.mxu1 %v1069_v15 }
 0x165   : > { %979 = vmatprep.subr.bf16.mxu1 %v1070_v16 }
 0x166   : > { %652 = vmatpush1.bf16.msra.mxu0 %v1058_v4 }
 0x167   : > { %653 = vmatprep.subr.bf16.mxu0 %v1063_v5 }
 0x168   : > { %980 = vmatpush3.bf16.msra.mxu1 %v1071_v17 }
 0x169   : > { %981 = vmatprep.subr.bf16.mxu1 %v1072_v18 }
 0x16a   : > { %654 = vmatpush1.bf16.msra.mxu0 %v1061_v8 }
 0x16c   : > { %982 = vmatpush3.bf16.msra.mxu1 %v1073_v19 }
 0x16d   : > { %983 = vmatprep.subr.bf16.mxu1 %v1074_v20 }
 0x170   : > { %984 = vmatpush3.bf16.msra.mxu1 %v1075_v21 }
 0x21d   : > { %v521_v61 = vpop.f32.mrf.mxu0 }
 0x21e   : > { %544 = vrot.lane.b32.xlu0 %v521_v61, %s1145_s25  ;;  %v530_v2 = vrot.slane %v521_v61, 7 }
 0x21f   : > { %v523_v63 = vpop.f32.mrf.mxu0 }
 0x220   : > { %v536_v24 = vrot.slane %v523_v63, 1 }
 0x221   : > { %v525_v1 = vpop.f32.mrf.mxu0 }
 0x222   : > { %v531_v3 = vrot.slane %v525_v1, 7  ;;  %546 = vrot.lane.b32.xlu1 %v525_v1, %s1145_s25  ;;  %s323_s25 = sand.u32 1, %s1132_s10  }
 0x223   : > { %v527_v22 = vpop.f32.mrf.mxu0  ;;  %s324_s24 = scalar_lea.vmem [#allocation2], %s323_s25  ;;  %s856_s14 = scalar_lea.sflag [#allocation3], %s323_s25 }
 0x224   : > { %v533_v6 = vsel %vm417_vm3, %v531_v3, %v530_v2  ;;  %v532_v7 = vsel %vm417_vm3, %v530_v2, %v531_v3  ;;  %v537_v23 = vrot.slane %v527_v22, 1  ;;  %s868_s26 = sshll.u32 %s324_s24, 4  ;;  %s869_s26 = int_to_ptr.vmem [resolvable:$true] %s868_s26 }
 0x225   : > { %v534_v26 = vmul.f32 %v1280_v34, %v533_v6  ;;  %v535_v33 = vmul.f32 %v1283_v35, %v532_v7  ;;  %s1080_s16 = scalar_lea.vmem %s869_s26, 16  ;;  %p1087_p0 = scmp.lt.s32.totalorder %s869_s26, %s1085_s17 }
 0x226   : > { %v538_v25 = vsel %vm432_vm8, %v536_v24, %v537_v23  ;;  %v539_v30 = vsel %vm432_vm8, %v537_v23, %v536_v24  ;;  %p1081_p11 = scmp.ne.s32.totalorder %s869_s26, %s1080_s16  ;;  %p1088_p1 = scmp.lt.s32.totalorder %s1086_s21, %s1080_s16 }
 0x227   : > { %v540_v28 = vmul.f32 %v1287_v39, %v538_v25  ;;  %v541_v38 = vmul.f32 %v1290_v40, %v539_v30  ;;  %v1076_v40 = vld [vmem:[%s1447_s7 + $0x48] sm:$0xff]  }
 0x228   : > { %985 = vmatprep.subr.bf16.mxu1 %v1076_v40  ;;  %p1082_p12 = pnand %p1081_p11, %p1236_p5  ;;  %p1089_p2 = por %p1088_p1, %p1087_p0 }
 0x229   : > { %986 = vmatpush3.bf16.msra.mxu1 %v1077_v53 }
 0x22a   : > { %987 = vmatprep.subr.bf16.mxu1 %v1078_v54  ;;  %p1083_p13 = pneg %p1082_p12 }
 0x22c   : > { %p1090_p3 = pnand %p1089_p2, %p1083_p13 }
 0x22d   : > { %988 = vmatpush3.bf16.msra.mxu1 %v1079_v55 }
 0x290   : > { %v545_v27 = vpop.permute.xlu0 %544 }
 0x291   : > { %v550_v29 = vadd.f32 %v545_v27, %v534_v26 }
 0x293   : > { %v552_v32 = vadd.f32 %v550_v29, %v540_v28 }
 0x294   : > { %v547_v36 = vpop.permute.xlu1 %546 }
 0x295   : > { %v561_v37 = vadd.f32 %v941_v31, %v552_v32  ;;  %v551_v41 = vadd.f32 %v547_v36, %v535_v33 }
 0x297   : > { %v553_v34 = vadd.f32 %v551_v41, %v541_v38  ;;  %v563_v42 = vmax.f32 %v561_v37, 0.0 }
 0x299   : > { %v562_v43 = vadd.f32 %v941_v31, %v553_v34  ;;  %v566_v44 = vsel %vm565_vm10, %v563_v42, 0.0 }
 0x29b   : > { %v564_v39 = vmax.f32 %v562_v43, 0.0 }
 0x29d   : > { %v567_v45 = vsel %vm565_vm10, %v564_v39, 0.0 }
 0x29e   : > { %v568_v46 = vadd.f32 %v567_v45, %v566_v44 }
 0x2a0   : > { %v569_v47 = vrot.slane %v568_v46, 4 }
 0x2a2   : > { %v570_v48 = vadd.f32 %v569_v47, %v568_v46 }
 0x2a4   : > { %v571_v49 = vrot.slane %v570_v48, 2 }
 0x2a6   : > { %v572_v50 = vadd.f32 %v571_v49, %v570_v48 }
 0x2a8   : > { %v573_v51 = vrot.slane %v572_v50, 1 }
 0x2aa   : > { %v574_v52 = vadd.f32 %v573_v51, %v572_v50 }
 0x2ac   : > { %v575_v35 = vpack.c.bf16 %v574_v52, %v574_v52 }
 0x2ae   : > { %950 = vmatmul.mubr.msk.bf16.vlgmr.msra.gmra.mxu0 %vm565_vm10, %v575_v35 }
 0x36e   : > { %v673_v61 = vpop.f32.mrf.mxu0 }
 0x36f   : > { %v674_v62 = vadd.f32 %v673_v61, %v629_v59 }
 0x370   : > { %v675_v63 = vpop.f32.mrf.mxu0 }
 0x371   : > { %v676_v0 = vadd.f32 %v675_v63, %v633_v60  ;;  %v680_v1 = vmax.f32 %v674_v62, 0.0 }
 0x372   : > { %v677_v2 = vpop.f32.mrf.mxu0 }
 0x373   : > { %v681_v3 = vmax.f32 %v676_v0, 0.0  ;;  %v682_v6 = vpack.c.bf16 %v680_v1, %v680_v1 }
 0x374   : > { %v678_v4 = vpop.f32.mrf.mxu0 }
 0x375   : > { %v683_v5 = vpack.c.bf16 %v681_v3, %v681_v3 }
 0x377   : > { %845 = vmatprep.mubr.bf16.mxu1 %v683_v5 }
 0x378   : > { %846 = vmatmul.mubr.bf16.vlgmr.msra.gmra.mxu1 %v682_v6 }
 0x438   : > { %v989_v7 = vpop.f32.mrf.mxu1 }
 0x43a   : > { %v990_v8 = vpop.f32.mrf.mxu1 }
 0x43b   : > { %v991_v9 = vadd.f32 %v990_v8, %v989_v7 }
 0x43c   : > { %v992_v10 = vpop.f32.mrf.mxu1 }
 0x43d   : > { %v848_v12 = vadd.f32 %v991_v9, %v716_v11 }
 0x43e   : > { %v993_v13 = vpop.f32.mrf.mxu1 }
 0x43f   : > { %854 = vst.msk [vmem:[%s324_s24] sm:$0x1] %vm853_vm11, %v848_v12 }
 0x440   : > { %1093 = shalt.err (!%p1090_p3)
}
 0x441   : > { %s1094_s22 = scalar_lea.hbm %s1405_s29, 16  ;;  %s1098_s24 = scalar_lea.hbm %s1449_s9, 32 }
 0x442   : > { %p1095_p4 = scmp.ne.s32.totalorder %s1405_s29, %s1094_s22  ;;  %p1099_p9 = scmp.lt.s32.totalorder %s1405_s29, %s1449_s9 }
 0x443   : > { %p1100_p10 = scmp.lt.s32.totalorder %s1098_s24, %s1094_s22 }
 0x444   : > { %p1096_p7 = pnand %p1095_p4, %p1236_p5 }
 0x445   : > { %p1101_p11 = por %p1100_p10, %p1099_p9 }
 0x446   : > { %p1097_p8 = pneg %p1096_p7 }
 0x448   : > { %p1102_p12 = pnand %p1101_p11, %p1097_p8 }
 0x44a   : > { %1105 = shalt.err (!%p1102_p12)
}
 0x44b   : > { %1001 = dma.vmem_to_hbm [thread:$0]  (%p1236_p5), %s869_s26, 16, %s1405_s29, %s856_s14  }
 0x44c PF: > { %p1007_p13 = scmp.ge.s32.totalorder %s1140_s12, 2  ;;  %s880_s16 = sand.u32 1, %s1128_s30  }
 0x44d   : > { %s881_s13 = scalar_lea.sflag [#allocation3], %s880_s16 }
 0x44e   : > { %p1004_p0 = pnand %p1007_p13, %p1240_p6 }
 0x450   : > { %p1005_p1 = pneg %p1004_p0 }
 0x452   : > { %1123 = dma.done.wait (%p1005_p1), %s881_s13, 16  }
 0x453   : > { %1125 = vsyncadd (%p1005_p1), %s881_s13, 4294967280  ;;  %p19_p2 = scmp.ge.s32.totalorder %s1223_s15, 4   ;;  %s1452_s30 = smov %s1132_s10 }
 0x454   : > { %s1453_s10 = smov %s1136_s11  ;;  %s1454_s11 = smov %s1234_s18 }
 0x455   : > { %s1455_s12 = smov %s1223_s15  ;;  %21 = sbr.rel (!%p19_p2) target bundleno = 3 (0x3), region = 91 }
 0x45a   :  { %885 = vsyncpa [#allocation3], 1 }
 0x45b   :  { %887 = vsyncpa [#allocation3 + $0x1], 1 }

</bundles_post_ra>
